<compile_context>
chip_gen: v7x
topology: tpu7x:2x2x1
jax: 0.10.0
libtpu: 0.0.40
codegen_flags: <defaults>
</compile_context>

<pallas_src>
import functools

import jax
import jax.numpy as jnp
from jax.experimental import pallas as pl
from jax.experimental.pallas import tpu as pltpu

EPS = 1e-5


# ---------------------------------------------------------------------------
# Static layout of the single parameter slab.
# ---------------------------------------------------------------------------

def _layout(in_n, out_n, lat):
    half_lat = lat // 2
    half_in = in_n // 2
    half_out = out_n // 2
    d_head = half_in + half_out          # merged decoder-head width
    d_cat = in_n + out_n                 # merged final output width
    k_f = d_head + half_lat              # rows of merged final weight

    wmax = max(half_lat, lat, d_head, d_cat)
    offs = {}
    r = 0
    offs["w1"] = r; r += in_n            # (in_n, half_lat)
    offs["w2"] = r; r += half_lat        # (half_lat, lat)
    offs["wd"] = r; r += lat             # (lat, d_head)
    offs["wf"] = r; r += k_f             # (k_f, d_cat)
    offs["bn1"] = r; r += 2              # (2, half_lat)  gamma; beta
    offs["bn2"] = r; r += 2              # (2, lat)
    offs["bnd"] = r; r += 2              # (2, d_head)
    offs["bnf"] = r; r += 2              # (2, d_cat)
    rows = -(-r // 8) * 8                # pad sublane dim to a multiple of 8
    dims = dict(in_n=in_n, out_n=out_n, lat=lat, half_lat=half_lat,
                half_in=half_in, half_out=half_out, d_head=d_head,
                d_cat=d_cat, k_f=k_f, wmax=wmax, rows=rows)
    return offs, dims


# ---------------------------------------------------------------------------
# Fused kernel
# ---------------------------------------------------------------------------

def _make_kernel(offs, dims):
    in_n = dims["in_n"]
    half_lat = dims["half_lat"]
    lat = dims["lat"]
    d_head = dims["d_head"]
    d_cat = dims["d_cat"]
    k_f = dims["k_f"]

    def bn_act(z, bn, relu):
        gamma = bn[0:1, :]
        beta = bn[1:2, :]
        # Two independent sublane reductions -> shorter critical path.
        m = jnp.mean(z, axis=0, keepdims=True)
        m2 = jnp.mean(z * z, axis=0, keepdims=True)
        var = m2 - m * m                  # biased variance (PyTorch BN train)
        y = (z - m) * jax.lax.rsqrt(var + EPS) * gamma + beta
        return jnp.maximum(y, 0.0) if relu else y

    def kernel(x_ref, p_ref, o1_ref, o2_ref):
        x = x_ref[...].astype(jnp.float32)

        # Static slices into the single parameter slab (no runtime cost).
        w1 = p_ref[offs["w1"]:offs["w1"] + in_n, :half_lat]
        w2 = p_ref[offs["w2"]:offs["w2"] + half_lat, :lat]
        wd = p_ref[offs["wd"]:offs["wd"] + lat, :d_head]
        wf = p_ref[offs["wf"]:offs["wf"] + k_f, :d_cat]
        bn1 = p_ref[offs["bn1"]:offs["bn1"] + 2, :half_lat]
        bn2 = p_ref[offs["bn2"]:offs["bn2"] + 2, :lat]
        bnd = p_ref[offs["bnd"]:offs["bnd"] + 2, :d_head]
        bnf = p_ref[offs["bnf"]:offs["bnf"] + 2, :d_cat]

        # encoder_layer1 / encoder_layer2
        x1_e = bn_act(jnp.dot(x, w1, preferred_element_type=jnp.float32),
                      bn1, relu=True)
        x2_e = bn_act(jnp.dot(x1_e, w2, preferred_element_type=jnp.float32),
                      bn2, relu=True)

        # decoder1_layer2 | decoder2_layer2 merged (shared input x2_e).
        d = bn_act(jnp.dot(x2_e, wd, preferred_element_type=jnp.float32),
                   bnd, relu=True)                      # (N, d_head)

        # decoder1_layer1 | decoder2_layer1 merged into ONE matmul:
        # the skip-concat is realized as a lane-concat of [d | x1_e] against a
        # stacked block-diagonal (d side) + shared (x1_e side) weight.
        cat = jnp.concatenate([d, x1_e], axis=-1)        # (N, k_f)
        y = bn_act(jnp.dot(cat, wf, preferred_element_type=jnp.float32),
                   bnf, relu=False)                      # (N, d_cat)

        o1_ref[...] = y[:, :in_n].astype(o1_ref.dtype)
        o2_ref[...] = y[:, in_n:].astype(o2_ref.dtype)

    return kernel


def unet_forward(x, params_slab, *, in_node_num, out_node_num,
                 latent_node_num):
    """Single (grid-less) fused pallas_call for the whole UNet."""
    offs, dims = _layout(in_node_num, out_node_num, latent_node_num)
    n = x.shape[0]
    kernel = _make_kernel(offs, dims)
    vmem = pl.BlockSpec(memory_space=pltpu.MemorySpace.VMEM)

    out1, out2 = pl.pallas_call(
        kernel,
        out_shape=(jax.ShapeDtypeStruct((n, in_node_num), jnp.float32),
                   jax.ShapeDtypeStruct((n, out_node_num), jnp.float32)),
        in_specs=[vmem, vmem],
        out_specs=(vmem, vmem),
    )(x, params_slab)
    return out1, out2


# ---------------------------------------------------------------------------
# Parameter construction (deterministic, synthetic) and fused packing.
# ---------------------------------------------------------------------------

def _init_block(key, din, dout):
    """kaiming_uniform-ish weight, small uniform bias, random BN affine."""
    kw, kb, kg, kbt = jax.random.split(key, 4)
    bound = jnp.sqrt(6.0 / din)
    w = jax.random.uniform(kw, (din, dout), jnp.float32, -bound, bound)
    bb = 1.0 / jnp.sqrt(din)
    b = jax.random.uniform(kb, (1, dout), jnp.float32, -bb, bb)
    gamma = 1.0 + 0.1 * jax.random.normal(kg, (1, dout), jnp.float32)
    beta = 0.1 * jax.random.normal(kbt, (1, dout), jnp.float32)
    return (w, b, gamma, beta)


def init_unet_params(key, in_node_num, out_node_num, latent_node_num):
    keys = jax.random.split(key, 6)
    half_lat = latent_node_num // 2
    half_in = in_node_num // 2
    half_out = out_node_num // 2
    return {
        "enc1": _init_block(keys[0], in_node_num, half_lat),
        "enc2": _init_block(keys[1], half_lat, latent_node_num),
        "dec1_l2": _init_block(keys[2], latent_node_num, half_in),
        "dec1_l1": _init_block(keys[3], half_in + half_lat, in_node_num),
        "dec2_l2": _init_block(keys[4], latent_node_num, half_out),
        "dec2_l1": _init_block(keys[5], half_out + half_lat, out_node_num),
    }


def pack_unet_params(params, in_node_num, out_node_num, latent_node_num):
    """Repack PyTorch-style per-block params into ONE fused parameter slab."""
    offs, dims = _layout(in_node_num, out_node_num, latent_node_num)
    half_in, half_out = dims["half_in"], dims["half_out"]
    d_head, d_cat, k_f = dims["d_head"], dims["d_cat"], dims["k_f"]

    w1, _, g1, b1 = params["enc1"]
    w2, _, g2, b2 = params["enc2"]
    w31, _, g31, b31 = params["dec1_l2"]                  # (lat, half_in)
    w32, _, g32, b32 = params["dec2_l2"]                  # (lat, half_out)
    w41, _, g41, b41 = params["dec1_l1"]                  # (half_in+half_lat, in)
    w42, _, g42, b42 = params["dec2_l1"]                  # (half_out+half_lat, out)

    # Merge the two decoder heads that share x2_e along Dout.
    wd = jnp.concatenate([w31, w32], axis=1)

    # Final merged weight: rows = [d1-head | d2-head | x1_e], block-diagonal
    # on the decoder-head rows, shared (side-by-side) on the x1_e rows.
    wf = jnp.zeros((k_f, d_cat), jnp.float32)
    wf = wf.at[:half_in, :in_node_num].set(w41[:half_in])
    wf = wf.at[half_in:d_head, in_node_num:].set(w42[:half_out])
    wf = wf.at[d_head:, :in_node_num].set(w41[half_in:])
    wf = wf.at[d_head:, in_node_num:].set(w42[half_out:])

    def bn_pack(gamma, beta):
        return jnp.concatenate([gamma, beta], axis=0)     # (2, D)

    bn1 = bn_pack(g1, b1)
    bn2 = bn_pack(g2, b2)
    bnd = bn_pack(jnp.concatenate([g31, g32], axis=1),
                  jnp.concatenate([b31, b32], axis=1))
    bnf = bn_pack(jnp.concatenate([g41, g42], axis=1),
                  jnp.concatenate([b41, b42], axis=1))

    # Linear biases are intentionally not packed: BN (train mode) cancels them.
    slab = jnp.zeros((dims["rows"], dims["wmax"]), jnp.float32)
    for name, arr in (("w1", w1), ("w2", w2), ("wd", wd), ("wf", wf),
                      ("bn1", bn1), ("bn2", bn2), ("bnd", bnd), ("bnf", bnf)):
        r, c = arr.shape
        slab = slab.at[offs[name]:offs[name] + r, :c].set(arr)
    return slab


# ---------------------------------------------------------------------------
# Pure-JAX reference (faithful to the PyTorch module, incl. Linear bias).
# ---------------------------------------------------------------------------

def _ref_block(x, params, activation=True):
    w, b, gamma, beta = params
    z = x @ w + b
    mean = jnp.mean(z, axis=0, keepdims=True)
    var = jnp.mean((z - mean) ** 2, axis=0, keepdims=True)
    y = (z - mean) / jnp.sqrt(var + EPS) * gamma + beta
    return jnp.maximum(y, 0.0) if activation else y


def _ref_forward(x, params):
    x1_e = _ref_block(x, params["enc1"])
    x2_e = _ref_block(x1_e, params["enc2"])
    x2_d1 = jnp.concatenate([_ref_block(x2_e, params["dec1_l2"]), x1_e], -1)
    x1_d1 = _ref_block(x2_d1, params["dec1_l1"], activation=False)
    x2_d2 = jnp.concatenate([_ref_block(x2_e, params["dec2_l2"]), x1_e], -1)
    x1_d2 = _ref_block(x2_d2, params["dec2_l1"], activation=False)
    return x1_d1, x1_d2


if __name__ == "__main__":
    # Small shapes consistent with the module: UNet(in=16, out=16, latent=32)
    in_node_num, out_node_num, latent_node_num = 16, 16, 32
    batch = 8

    key = jax.random.PRNGKey(0)
    kx, kp = jax.random.split(key)
    x = jax.random.normal(kx, (batch, in_node_num), jnp.float32)
    params = init_unet_params(kp, in_node_num, out_node_num, latent_node_num)
    slab = pack_unet_params(params, in_node_num, out_node_num,
                            latent_node_num)

    fwd = jax.jit(functools.partial(unet_forward,
                                    in_node_num=in_node_num,
                                    out_node_num=out_node_num,
                                    latent_node_num=latent_node_num))
    out1, out2 = fwd(x, slab)
    jax.block_until_ready((out1, out2))

    ref1, ref2 = _ref_forward(x, params)
    assert out1.shape == (batch, in_node_num)
    assert out2.shape == (batch, out_node_num)
    assert jnp.allclose(out1, ref1, atol=1e-4, rtol=1e-4)
    assert jnp.allclose(out2, ref2, atol=1e-4, rtol=1e-4)

    print("KERNEL_OK")
</pallas_src>

<mosaic_0001>
module attributes {stable_mosaic.version = 11 : i64} {
  func.func @kernel(%arg0: memref<8x16xf32, #tpu.memory_space<vmem>>, %arg1: memref<104x32xf32, #tpu.memory_space<vmem>>, %arg2: memref<8x16xf32, #tpu.memory_space<vmem>>, %arg3: memref<8x16xf32, #tpu.memory_space<vmem>>) attributes {dimension_semantics = [], scalar_prefetch = 0 : i64, scratch_operands = 0 : i64, tpu.core_type = #tpu.core_type<tc>} {
    %c0 = arith.constant 0 : index
    %c0_0 = arith.constant 0 : index
    %0 = vector.load %arg0[%c0, %c0_0] : memref<8x16xf32, #tpu.memory_space<vmem>>, vector<8x16xf32>
    %c0_1 = arith.constant 0 : index
    %c0_2 = arith.constant 0 : index
    %1 = vector.load %arg1[%c0_1, %c0_2] : memref<104x32xf32, #tpu.memory_space<vmem>>, vector<16x16xf32>
    %c16 = arith.constant 16 : index
    %c0_3 = arith.constant 0 : index
    %2 = vector.load %arg1[%c16, %c0_3] : memref<104x32xf32, #tpu.memory_space<vmem>>, vector<16x32xf32>
    %c32 = arith.constant 32 : index
    %c0_4 = arith.constant 0 : index
    %3 = vector.load %arg1[%c32, %c0_4] : memref<104x32xf32, #tpu.memory_space<vmem>>, vector<32x16xf32>
    %c64 = arith.constant 64 : index
    %c0_5 = arith.constant 0 : index
    %4 = vector.load %arg1[%c64, %c0_5] : memref<104x32xf32, #tpu.memory_space<vmem>>, vector<32x32xf32>
    %c96 = arith.constant 96 : index
    %c0_6 = arith.constant 0 : index
    %5 = vector.load %arg1[%c96, %c0_6] : memref<104x32xf32, #tpu.memory_space<vmem>>, vector<2x16xf32>
    %c98 = arith.constant 98 : index
    %c0_7 = arith.constant 0 : index
    %6 = vector.load %arg1[%c98, %c0_7] : memref<104x32xf32, #tpu.memory_space<vmem>>, vector<2x32xf32>
    %c100 = arith.constant 100 : index
    %c0_8 = arith.constant 0 : index
    %7 = vector.load %arg1[%c100, %c0_8] : memref<104x32xf32, #tpu.memory_space<vmem>>, vector<2x16xf32>
    %c102 = arith.constant 102 : index
    %c0_9 = arith.constant 0 : index
    %8 = vector.load %arg1[%c102, %c0_9] : memref<104x32xf32, #tpu.memory_space<vmem>>, vector<2x32xf32>
    %cst = arith.constant dense<0.000000e+00> : vector<8x16xf32>
    %9 = tpu.matmul %0, %1, %cst {dimension_numbers = #tpu.dot_dimension_numbers<[1], [0], [0], [1], [0, 0, 1, 1], [], []>} : vector<8x16xf32>, vector<16x16xf32>, vector<8x16xf32> -> vector<8x16xf32>
    %10 = vector.extract_strided_slice %5 {offsets = [0, 0], sizes = [1, 16], strides = [1, 1]} : vector<2x16xf32> to vector<1x16xf32>
    %11 = vector.extract_strided_slice %5 {offsets = [1, 0], sizes = [1, 16], strides = [1, 1]} : vector<2x16xf32> to vector<1x16xf32>
    %cst_10 = arith.constant dense<0.000000e+00> : vector<16xf32>
    %12 = vector.multi_reduction <add>, %9, %cst_10 [0] : vector<8x16xf32> to vector<16xf32>
    %13 = vector.shape_cast %12 : vector<16xf32> to vector<1x16xf32>
    %cst_11 = arith.constant 8.000000e+00 : f32
    %14 = vector.broadcast %cst_11 : f32 to vector<1x16xf32>
    %15 = arith.divf %13, %14 : vector<1x16xf32>
    %16 = arith.mulf %9, %9 : vector<8x16xf32>
    %cst_12 = arith.constant dense<0.000000e+00> : vector<16xf32>
    %17 = vector.multi_reduction <add>, %16, %cst_12 [0] : vector<8x16xf32> to vector<16xf32>
    %18 = vector.shape_cast %17 : vector<16xf32> to vector<1x16xf32>
    %cst_13 = arith.constant 8.000000e+00 : f32
    %19 = vector.broadcast %cst_13 : f32 to vector<1x16xf32>
    %20 = arith.divf %18, %19 : vector<1x16xf32>
    %21 = arith.mulf %15, %15 : vector<1x16xf32>
    %22 = arith.subf %20, %21 : vector<1x16xf32>
    %23 = vector.broadcast %15 : vector<1x16xf32> to vector<8x16xf32>
    %24 = arith.subf %9, %23 : vector<8x16xf32>
    %cst_14 = arith.constant 9.99999974E-6 : f32
    %25 = vector.broadcast %cst_14 : f32 to vector<1x16xf32>
    %26 = arith.addf %22, %25 : vector<1x16xf32>
    %27 = math.rsqrt %26 : vector<1x16xf32>
    %28 = vector.broadcast %27 : vector<1x16xf32> to vector<8x16xf32>
    %29 = arith.mulf %24, %28 : vector<8x16xf32>
    %30 = vector.broadcast %10 : vector<1x16xf32> to vector<8x16xf32>
    %31 = arith.mulf %29, %30 : vector<8x16xf32>
    %32 = vector.broadcast %11 : vector<1x16xf32> to vector<8x16xf32>
    %33 = arith.addf %31, %32 : vector<8x16xf32>
    %cst_15 = arith.constant 0.000000e+00 : f32
    %34 = vector.broadcast %cst_15 : f32 to vector<8x16xf32>
    %35 = arith.maximumf %33, %34 : vector<8x16xf32>
    %cst_16 = arith.constant dense<0.000000e+00> : vector<8x32xf32>
    %36 = tpu.matmul %35, %2, %cst_16 {dimension_numbers = #tpu.dot_dimension_numbers<[1], [0], [0], [1], [0, 0, 1, 1], [], []>} : vector<8x16xf32>, vector<16x32xf32>, vector<8x32xf32> -> vector<8x32xf32>
    %37 = vector.extract_strided_slice %6 {offsets = [0, 0], sizes = [1, 32], strides = [1, 1]} : vector<2x32xf32> to vector<1x32xf32>
    %38 = vector.extract_strided_slice %6 {offsets = [1, 0], sizes = [1, 32], strides = [1, 1]} : vector<2x32xf32> to vector<1x32xf32>
    %cst_17 = arith.constant dense<0.000000e+00> : vector<32xf32>
    %39 = vector.multi_reduction <add>, %36, %cst_17 [0] : vector<8x32xf32> to vector<32xf32>
    %40 = vector.shape_cast %39 : vector<32xf32> to vector<1x32xf32>
    %cst_18 = arith.constant 8.000000e+00 : f32
    %41 = vector.broadcast %cst_18 : f32 to vector<1x32xf32>
    %42 = arith.divf %40, %41 : vector<1x32xf32>
    %43 = arith.mulf %36, %36 : vector<8x32xf32>
    %cst_19 = arith.constant dense<0.000000e+00> : vector<32xf32>
    %44 = vector.multi_reduction <add>, %43, %cst_19 [0] : vector<8x32xf32> to vector<32xf32>
    %45 = vector.shape_cast %44 : vector<32xf32> to vector<1x32xf32>
    %cst_20 = arith.constant 8.000000e+00 : f32
    %46 = vector.broadcast %cst_20 : f32 to vector<1x32xf32>
    %47 = arith.divf %45, %46 : vector<1x32xf32>
    %48 = arith.mulf %42, %42 : vector<1x32xf32>
    %49 = arith.subf %47, %48 : vector<1x32xf32>
    %50 = vector.broadcast %42 : vector<1x32xf32> to vector<8x32xf32>
    %51 = arith.subf %36, %50 : vector<8x32xf32>
    %cst_21 = arith.constant 9.99999974E-6 : f32
    %52 = vector.broadcast %cst_21 : f32 to vector<1x32xf32>
    %53 = arith.addf %49, %52 : vector<1x32xf32>
    %54 = math.rsqrt %53 : vector<1x32xf32>
    %55 = vector.broadcast %54 : vector<1x32xf32> to vector<8x32xf32>
    %56 = arith.mulf %51, %55 : vector<8x32xf32>
    %57 = vector.broadcast %37 : vector<1x32xf32> to vector<8x32xf32>
    %58 = arith.mulf %56, %57 : vector<8x32xf32>
    %59 = vector.broadcast %38 : vector<1x32xf32> to vector<8x32xf32>
    %60 = arith.addf %58, %59 : vector<8x32xf32>
    %cst_22 = arith.constant 0.000000e+00 : f32
    %61 = vector.broadcast %cst_22 : f32 to vector<8x32xf32>
    %62 = arith.maximumf %60, %61 : vector<8x32xf32>
    %cst_23 = arith.constant dense<0.000000e+00> : vector<8x16xf32>
    %63 = tpu.matmul %62, %3, %cst_23 {dimension_numbers = #tpu.dot_dimension_numbers<[1], [0], [0], [1], [0, 0, 1, 1], [], []>} : vector<8x32xf32>, vector<32x16xf32>, vector<8x16xf32> -> vector<8x16xf32>
    %64 = vector.extract_strided_slice %7 {offsets = [0, 0], sizes = [1, 16], strides = [1, 1]} : vector<2x16xf32> to vector<1x16xf32>
    %65 = vector.extract_strided_slice %7 {offsets = [1, 0], sizes = [1, 16], strides = [1, 1]} : vector<2x16xf32> to vector<1x16xf32>
    %cst_24 = arith.constant dense<0.000000e+00> : vector<16xf32>
    %66 = vector.multi_reduction <add>, %63, %cst_24 [0] : vector<8x16xf32> to vector<16xf32>
    %67 = vector.shape_cast %66 : vector<16xf32> to vector<1x16xf32>
    %cst_25 = arith.constant 8.000000e+00 : f32
    %68 = vector.broadcast %cst_25 : f32 to vector<1x16xf32>
    %69 = arith.divf %67, %68 : vector<1x16xf32>
    %70 = arith.mulf %63, %63 : vector<8x16xf32>
    %cst_26 = arith.constant dense<0.000000e+00> : vector<16xf32>
    %71 = vector.multi_reduction <add>, %70, %cst_26 [0] : vector<8x16xf32> to vector<16xf32>
    %72 = vector.shape_cast %71 : vector<16xf32> to vector<1x16xf32>
    %cst_27 = arith.constant 8.000000e+00 : f32
    %73 = vector.broadcast %cst_27 : f32 to vector<1x16xf32>
    %74 = arith.divf %72, %73 : vector<1x16xf32>
    %75 = arith.mulf %69, %69 : vector<1x16xf32>
    %76 = arith.subf %74, %75 : vector<1x16xf32>
    %77 = vector.broadcast %69 : vector<1x16xf32> to vector<8x16xf32>
    %78 = arith.subf %63, %77 : vector<8x16xf32>
    %cst_28 = arith.constant 9.99999974E-6 : f32
    %79 = vector.broadcast %cst_28 : f32 to vector<1x16xf32>
    %80 = arith.addf %76, %79 : vector<1x16xf32>
    %81 = math.rsqrt %80 : vector<1x16xf32>
    %82 = vector.broadcast %81 : vector<1x16xf32> to vector<8x16xf32>
    %83 = arith.mulf %78, %82 : vector<8x16xf32>
    %84 = vector.broadcast %64 : vector<1x16xf32> to vector<8x16xf32>
    %85 = arith.mulf %83, %84 : vector<8x16xf32>
    %86 = vector.broadcast %65 : vector<1x16xf32> to vector<8x16xf32>
    %87 = arith.addf %85, %86 : vector<8x16xf32>
    %cst_29 = arith.constant 0.000000e+00 : f32
    %88 = vector.broadcast %cst_29 : f32 to vector<8x16xf32>
    %89 = arith.maximumf %87, %88 : vector<8x16xf32>
    %90 = tpu.concatenate %89, %35 in 1 : vector<8x16xf32>, vector<8x16xf32> -> vector<8x32xf32>
    %cst_30 = arith.constant dense<0.000000e+00> : vector<8x32xf32>
    %91 = tpu.matmul %90, %4, %cst_30 {dimension_numbers = #tpu.dot_dimension_numbers<[1], [0], [0], [1], [0, 0, 1, 1], [], []>} : vector<8x32xf32>, vector<32x32xf32>, vector<8x32xf32> -> vector<8x32xf32>
    %92 = vector.extract_strided_slice %8 {offsets = [0, 0], sizes = [1, 32], strides = [1, 1]} : vector<2x32xf32> to vector<1x32xf32>
    %93 = vector.extract_strided_slice %8 {offsets = [1, 0], sizes = [1, 32], strides = [1, 1]} : vector<2x32xf32> to vector<1x32xf32>
    %cst_31 = arith.constant dense<0.000000e+00> : vector<32xf32>
    %94 = vector.multi_reduction <add>, %91, %cst_31 [0] : vector<8x32xf32> to vector<32xf32>
    %95 = vector.shape_cast %94 : vector<32xf32> to vector<1x32xf32>
    %cst_32 = arith.constant 8.000000e+00 : f32
    %96 = vector.broadcast %cst_32 : f32 to vector<1x32xf32>
    %97 = arith.divf %95, %96 : vector<1x32xf32>
    %98 = arith.mulf %91, %91 : vector<8x32xf32>
    %cst_33 = arith.constant dense<0.000000e+00> : vector<32xf32>
    %99 = vector.multi_reduction <add>, %98, %cst_33 [0] : vector<8x32xf32> to vector<32xf32>
    %100 = vector.shape_cast %99 : vector<32xf32> to vector<1x32xf32>
    %cst_34 = arith.constant 8.000000e+00 : f32
    %101 = vector.broadcast %cst_34 : f32 to vector<1x32xf32>
    %102 = arith.divf %100, %101 : vector<1x32xf32>
    %103 = arith.mulf %97, %97 : vector<1x32xf32>
    %104 = arith.subf %102, %103 : vector<1x32xf32>
    %105 = vector.broadcast %97 : vector<1x32xf32> to vector<8x32xf32>
    %106 = arith.subf %91, %105 : vector<8x32xf32>
    %cst_35 = arith.constant 9.99999974E-6 : f32
    %107 = vector.broadcast %cst_35 : f32 to vector<1x32xf32>
    %108 = arith.addf %104, %107 : vector<1x32xf32>
    %109 = math.rsqrt %108 : vector<1x32xf32>
    %110 = vector.broadcast %109 : vector<1x32xf32> to vector<8x32xf32>
    %111 = arith.mulf %106, %110 : vector<8x32xf32>
    %112 = vector.broadcast %92 : vector<1x32xf32> to vector<8x32xf32>
    %113 = arith.mulf %111, %112 : vector<8x32xf32>
    %114 = vector.broadcast %93 : vector<1x32xf32> to vector<8x32xf32>
    %115 = arith.addf %113, %114 : vector<8x32xf32>
    %116 = vector.extract_strided_slice %115 {offsets = [0, 0], sizes = [8, 16], strides = [1, 1]} : vector<8x32xf32> to vector<8x16xf32>
    %c0_36 = arith.constant 0 : index
    %c0_37 = arith.constant 0 : index
    %117 = vector.load %arg2[%c0_36, %c0_37] : memref<8x16xf32, #tpu.memory_space<vmem>>, vector<8x16xf32>
    tpu.vector_store %arg2[%c0_36, %c0_37], %116 {strides = array<i32>} : memref<8x16xf32, #tpu.memory_space<vmem>>, vector<8x16xf32>,
    %118 = vector.extract_strided_slice %115 {offsets = [0, 16], sizes = [8, 16], strides = [1, 1]} : vector<8x32xf32> to vector<8x16xf32>
    %c0_38 = arith.constant 0 : index
    %c0_39 = arith.constant 0 : index
    %119 = vector.load %arg3[%c0_38, %c0_39] : memref<8x16xf32, #tpu.memory_space<vmem>>, vector<8x16xf32>
    tpu.vector_store %arg3[%c0_38, %c0_39], %118 {strides = array<i32>} : memref<8x16xf32, #tpu.memory_space<vmem>>, vector<8x16xf32>,
    return
  }
}

</mosaic_0001>

<bundles_post_ra>
// kernel: unet_forward.1
= control target key start
LH: loop header
LB: loop body
LE: loop exit
PB: predicated region body
PF: predicated region fallthrough
CT: control target
= control target key end

     0   :  { %9 = vsyncpa [#allocation3], 0  ;;  %v637_v2 = vmov 0.0|0.0   ;;  %vm638_vm0 = vmmov 0   ;;  %v639_v4 = vmov 0.0   ;;  %s776_s0 = inlined_call_operand.vmem [shape: f32[8,16], index: 0, kind: input, shape index: {}]   ;;  %s777_s1 = inlined_call_operand.vmem [shape: f32[104,32], index: 1, kind: input, shape index: {}]   ;;  %s778_s2 = inlined_call_operand.hbm [shape: f32[8,16], index: 2, kind: output, shape index: {0}]   ;;  %s779_s3 = inlined_call_operand.hbm [shape: f32[8,16], index: 3, kind: output, shape index: {1}]  }
   0x1   :  { %v16_v0 = vld [vmem:[%s777_s1] sm:$0xff]  ;;  %v17_v1 = vld [vmem:[%s777_s1 + $0x8] sm:$0xff]  ;;  %556 = vmatprep.subr.bf16.mxu0 %v637_v2  ;;  %524 = vmatprep.mubr.msk.f32.mxu0 %vm638_vm0, %v639_v4 }
   0x2   :  { %v557_v3 = vpack.c.bf16 %v17_v1, %v16_v0 }
   0x3   :  { %10 = vsyncpa [#allocation5], 0  ;;  %559 = vmatprep.subr.bf16.mxu1 %v637_v2  ;;  %531 = vmatprep.mubr.msk.f32.mxu1 %vm638_vm0, %v639_v4  ;;  %v15_v5 = vld [vmem:[%s776_s0] sm:$0xff]  ;;  %vm32_vm1 = vcmask 130048   ;;  %v18_v6 = vld [vmem:[%s777_s1 + $0x10] sm:$0xff]  ;;  %v130_v30 = vlaneseq  ;;  %s640_s23 = smov 16  }
   0x4   :  { %558 = vmatpush3.bf16.msra.mxu0 %v557_v3  ;;  %v19_v7 = vld [vmem:[%s777_s1 + $0x18] sm:$0xff]  ;;  %v28_v34 = vld [vmem:[%s777_s1 + $0x60] sm:$0x3]  ;;  %v21_v45 = vld [vmem:[%s777_s1 + $0x28] sm:$0xff]  ;;  %vm214_vm2 = vcmask 261120   ;;  %s641_s19 = smov [#allocation2]  }
   0x5   :  { %562 = vmatprep.subr.bf16.mxu0 %v637_v2  ;;  %v560_v8 = vpack.c.bf16 %v19_v7, %v18_v6  ;;  %v131_v32 = vshrl.u32 %v130_v30, 7  ;;  %v20_v44 = vld [vmem:[%s777_s1 + $0x20] sm:$0xff]  ;;  %v22_v47 = vld [vmem:[%s777_s1 + $0x30] sm:$0xff]  ;;  %v23_v48 = vld [vmem:[%s777_s1 + $0x38] sm:$0xff]  ;;  %s478_s20 = sshll.u32 %s641_s19, 4  ;;  %s642_s21 = smov 112   ;;  %s479_s20 = int_to_ptr.vmem [resolvable:$true] %s478_s20 }
   0x6   :  { %v563_v46 = vpack.c.bf16 %v21_v45, %v20_v44  ;;  %v566_v49 = vpack.c.bf16 %v23_v48, %v22_v47  ;;  %v30_v47 = vld [vmem:[%s777_s1 + $0x64] sm:$0x3]  ;;  %s589_s0 = scalar_lea.vmem %s479_s20, 128  ;;  %p594_p1 = scmp.lt.s32.totalorder %s479_s20, %s479_s20 }
   0x7   :  { %525 = vmatmul.mubr.msk.f32.vlgmr.msra.gmra.mrb[0].mxu0 %vm32_vm1, %v15_v5  ;;  %561 = vmatpush3.bf16.msra.mxu1 %v560_v8  ;;  %v689_v33 = vsub.s32 0, %v131_v32  ;;  %v694_v35 = vsub.s32 1, %v131_v32  ;;  %p590_p0 = scmp.ne.s32.totalorder %s479_s20, %s589_s0  ;;  %p595_p2 = scmp.lt.s32.totalorder %s589_s0, %s589_s0 }
   0x8   :  { %542 = vmatprep.mubr.msk.f32.mxu0 %vm638_vm0, %v639_v4  ;;  %568 = vmatprep.subr.bf16.mxu1 %v637_v2 }
   0x9   :  { %v133_v37 = vrot.slane %v28_v34, %v689_v33  ;;  %v138_v40 = vrot.slane %v28_v34, %v694_v35  ;;  %564 = vmatpush3.bf16.msra.mxu0 %v563_v46  ;;  %p596_p3 = por %p595_p2, %p594_p1 }
   0xa   :  { %565 = vmatprep.subr.bf16.mxu0 %v637_v2 }
   0xb   :  { %p597_p4 = pnand %p596_p3, %p590_p0 }
   0xd   :  { %567 = vmatpush3.bf16.msra.mxu0 %v566_v49  ;;  %v348_v49 = vrot.slane %v30_v47, %v689_v33 }
  0xda   :  { %v102_v9 = vpop.f32.mrb[0].mxu0 }
  0xdb   :  { %v106_v10 = vsel %vm32_vm1, %v102_v9, 0.0  ;;  %v115_v11 = vmul.f32 %v102_v9, %v102_v9  ;;  %v526_v12 = vpop.f32.mrb[1].mxu0 }
  0xdc   :  { %v107_v13 = vrot.slane %v106_v10, 4 }
  0xdd   :  { %v116_v14 = vsel %vm32_vm1, %v115_v11, 0.0 }
  0xde   :  { %v108_v15 = vadd.f32 %v107_v13, %v106_v10  ;;  %v117_v16 = vrot.slane %v116_v14, 4 }
  0xe0   :  { %v109_v17 = vrot.slane %v108_v15, 2  ;;  %v118_v18 = vadd.f32 %v117_v16, %v116_v14 }
  0xe2   :  { %v110_v19 = vadd.f32 %v109_v17, %v108_v15  ;;  %v119_v20 = vrot.slane %v118_v18, 2 }
  0xe4   :  { %v111_v21 = vrot.slane %v110_v19, 1  ;;  %v120_v22 = vadd.f32 %v119_v20, %v118_v18  ;;  %v24_v18 = vld [vmem:[%s777_s1 + $0x40] sm:$0xff] }
  0xe6   :  { %v112_v23 = vadd.f32 %v111_v21, %v110_v19  ;;  %v121_v24 = vrot.slane %v120_v22, 1  ;;  %v25_v19 = vld [vmem:[%s777_s1 + $0x48] sm:$0xff]  ;;  %v26_v21 = vld [vmem:[%s777_s1 + $0x50] sm:$0xff] }
  0xe7   :  { %v569_v20 = vpack.c.bf16 %v25_v19, %v24_v18 }
  0xe8   :  { %v114_v25 = vmul.f32 0.125, %v112_v23  ;;  %v122_v26 = vadd.f32 %v121_v24, %v120_v22  ;;  %v27_v22 = vld [vmem:[%s777_s1 + $0x58] sm:$0xff] }
  0xe9   :  { %v572_v23 = vpack.c.bf16 %v27_v22, %v26_v21 }
  0xea   :  { %v123_v27 = vmul.f32 0.125, %v122_v26  ;;  %v124_v28 = vmul.f32 %v114_v25, %v114_v25  ;;  %v126_v36 = vsub.f32 %v102_v9, %v114_v25  ;;  %v29_v9 = vld [vmem:[%s777_s1 + $0x62] sm:$0x3] }
  0xeb   :  { %v241_v11 = vrot.slane %v29_v9, %v689_v33  ;;  %v246_v14 = vrot.slane %v29_v9, %v694_v35 }
  0xec   :  { %v125_v29 = vsub.f32 %v123_v27, %v124_v28 }
  0xee   :  { %v127_v31 = vadd.f32 1e-05, %v125_v29 }
  0xf0   :  { %581 = vrsqrt.f32 %v127_v31 }
  0xfa   :  { %v582_v38 = vpop.eup %581 }
  0xfb   :  { %v129_v39 = vmul.f32 %v582_v38, %v126_v36 }
  0xfd   :  { %v134_v41 = vmul.f32 %v133_v37, %v129_v39 }
  0xff   :  { %v139_v42 = vadd.f32 %v138_v40, %v134_v41 }
 0x101   :  { %v140_v43 = vmax.f32 %v139_v42, 0.0 }
 0x103   :  { %356 = vrot.lane.b32.xlu0 %v140_v43, %s640_s23  ;;  %532 = vmatmul.mubr.msk.f32.vlgmr.msra.gmra.mrb[0].mxu1 %vm32_vm1, %v140_v43 }
 0x104   :  { %553 = vmatprep.mubr.msk.f32.mxu1 %vm638_vm0, %v639_v4  ;;  %570 = vmatpush3.bf16.msra.mxu1 %v569_v20 }
 0x105   :  { %571 = vmatprep.subr.bf16.mxu1 %v637_v2 }
 0x108   :  { %573 = vmatpush3.bf16.msra.mxu1 %v572_v23 }
 0x1d6   :  { %v210_v50 = vpop.f32.mrb[0].mxu1 }
 0x1d7   :  { %v215_v51 = vsel %vm214_vm2, %v210_v50, 0.0  ;;  %v223_v52 = vmul.f32 %v210_v50, %v210_v50  ;;  %v533_v53 = vpop.f32.mrb[1].mxu1 }
 0x1d8   :  { %v216_v54 = vrot.slane %v215_v51, 4 }
 0x1d9   :  { %v224_v55 = vsel %vm214_vm2, %v223_v52, 0.0  ;;  %v353_v52 = vrot.slane %v30_v47, %v694_v35 }
 0x1da   :  { %v217_v56 = vadd.f32 %v216_v54, %v215_v51  ;;  %v225_v57 = vrot.slane %v224_v55, 4 }
 0x1dc   :  { %v218_v58 = vrot.slane %v217_v56, 2  ;;  %v226_v59 = vadd.f32 %v225_v57, %v224_v55 }
 0x1de   :  { %v219_v60 = vadd.f32 %v218_v58, %v217_v56  ;;  %v227_v61 = vrot.slane %v226_v59, 2  ;;  %v357_v56 = vpop.permute.xlu0 %356 }
 0x1e0   :  { %v220_v62 = vrot.slane %v219_v60, 1  ;;  %v228_v63 = vadd.f32 %v227_v61, %v226_v59 }
 0x1e2   :  { %v221_v0 = vadd.f32 %v220_v62, %v219_v60  ;;  %v229_v1 = vrot.slane %v228_v63, 1 }
 0x1e4   :  { %v222_v3 = vmul.f32 0.125, %v221_v0  ;;  %v230_v4 = vadd.f32 %v229_v1, %v228_v63 }
 0x1e6   :  { %v231_v5 = vmul.f32 0.125, %v230_v4  ;;  %v232_v6 = vmul.f32 %v222_v3, %v222_v3  ;;  %v234_v10 = vsub.f32 %v210_v50, %v222_v3 }
 0x1e8   :  { %v233_v7 = vsub.f32 %v231_v5, %v232_v6 }
 0x1ea   :  { %v235_v8 = vadd.f32 1e-05, %v233_v7 }
 0x1ec   :  { %583 = vrsqrt.f32 %v235_v8 }
 0x1f6   :  { %v584_v12 = vpop.eup %583 }
 0x1f7   :  { %v237_v13 = vmul.f32 %v584_v12, %v234_v10 }
 0x1f9   :  { %v242_v15 = vmul.f32 %v241_v11, %v237_v13 }
 0x1fb   :  { %v247_v16 = vadd.f32 %v246_v14, %v242_v15 }
 0x1fd   :  { %v248_v17 = vmax.f32 %v247_v16, 0.0 }
 0x1ff   :  { %543 = vmatmul.mubr.msk.f32.vlgmr.msra.gmra.mrb[2].mxu0 %vm214_vm2, %v248_v17  ;;  %v31_v17 = vld [vmem:[%s777_s1 + $0x66] sm:$0x3] }
 0x200   :  { %v459_v19 = vrot.slane %v31_v17, %v689_v33  ;;  %v464_v22 = vrot.slane %v31_v17, %v694_v35 }
 0x2d2   :  { %v318_v24 = vpop.f32.mrb[2].mxu0 }
 0x2d3   :  { %v322_v25 = vsel %vm32_vm1, %v318_v24, 0.0  ;;  %v330_v26 = vmul.f32 %v318_v24, %v318_v24  ;;  %v544_v27 = vpop.f32.mrb[3].mxu0 }
 0x2d4   :  { %v323_v28 = vrot.slane %v322_v25, 4 }
 0x2d5   :  { %v331_v29 = vsel %vm32_vm1, %v330_v26, 0.0 }
 0x2d6   :  { %v324_v30 = vadd.f32 %v323_v28, %v322_v25  ;;  %v332_v2 = vrot.slane %v331_v29, 4 }
 0x2d8   :  { %v325_v31 = vrot.slane %v324_v30, 2  ;;  %v333_v32 = vadd.f32 %v332_v2, %v331_v29 }
 0x2da   :  { %v326_v34 = vadd.f32 %v325_v31, %v324_v30  ;;  %v334_v36 = vrot.slane %v333_v32, 2 }
 0x2dc   :  { %v327_v37 = vrot.slane %v326_v34, 1  ;;  %v335_v38 = vadd.f32 %v334_v36, %v333_v32 }
 0x2de   :  { %v328_v39 = vadd.f32 %v327_v37, %v326_v34  ;;  %v336_v40 = vrot.slane %v335_v38, 1 }
 0x2e0   :  { %v329_v41 = vmul.f32 0.125, %v328_v39  ;;  %v337_v42 = vadd.f32 %v336_v40, %v335_v38 }
 0x2e2   :  { %v338_v43 = vmul.f32 0.125, %v337_v42  ;;  %v339_v44 = vmul.f32 %v329_v41, %v329_v41  ;;  %v341_v48 = vsub.f32 %v318_v24, %v329_v41 }
 0x2e4   :  { %v340_v45 = vsub.f32 %v338_v43, %v339_v44 }
 0x2e6   :  { %v342_v46 = vadd.f32 1e-05, %v340_v45 }
 0x2e8   :  { %585 = vrsqrt.f32 %v342_v46 }
 0x2f2   :  { %v586_v50 = vpop.eup %585 }
 0x2f3   :  { %v344_v51 = vmul.f32 %v586_v50, %v341_v48 }
 0x2f5   :  { %v349_v53 = vmul.f32 %v348_v49, %v344_v51 }
 0x2f7   :  { %v354_v54 = vadd.f32 %v353_v52, %v349_v53 }
 0x2f9   :  { %v355_v55 = vmax.f32 %v354_v54, 0.0 }
 0x2fb   :  { %v359_v57 = vsel %vm32_vm1, %v355_v55, %v357_v56 }
 0x2fc   :  { %554 = vmatmul.mubr.msk.f32.vlgmr.msra.gmra.mrb[2].mxu1 %vm214_vm2, %v359_v57 }
 0x3cf   :  { %v429_v58 = vpop.f32.mrb[2].mxu1 }
 0x3d0   :  { %v433_v59 = vsel %vm214_vm2, %v429_v58, 0.0  ;;  %v441_v60 = vmul.f32 %v429_v58, %v429_v58  ;;  %v555_v61 = vpop.f32.mrb[3].mxu1 }
 0x3d1   :  { %v434_v62 = vrot.slane %v433_v59, 4 }
 0x3d2   :  { %v442_v63 = vsel %vm214_vm2, %v441_v60, 0.0 }
 0x3d3   :  { %v435_v0 = vadd.f32 %v434_v62, %v433_v59  ;;  %v443_v1 = vrot.slane %v442_v63, 4 }
 0x3d5   :  { %v436_v3 = vrot.slane %v435_v0, 2  ;;  %v444_v4 = vadd.f32 %v443_v1, %v442_v63 }
 0x3d7   :  { %v437_v5 = vadd.f32 %v436_v3, %v435_v0  ;;  %v445_v6 = vrot.slane %v444_v4, 2 }
 0x3d9   :  { %v438_v7 = vrot.slane %v437_v5, 1  ;;  %v446_v8 = vadd.f32 %v445_v6, %v444_v4 }
 0x3db   :  { %v439_v9 = vadd.f32 %v438_v7, %v437_v5  ;;  %v447_v10 = vrot.slane %v446_v8, 1 }
 0x3dd   :  { %v440_v11 = vmul.f32 0.125, %v439_v9  ;;  %v448_v12 = vadd.f32 %v447_v10, %v446_v8 }
 0x3df   :  { %v449_v13 = vmul.f32 0.125, %v448_v12  ;;  %v450_v14 = vmul.f32 %v440_v11, %v440_v11  ;;  %v452_v18 = vsub.f32 %v429_v58, %v440_v11 }
 0x3e1   :  { %v451_v15 = vsub.f32 %v449_v13, %v450_v14 }
 0x3e3   :  { %v453_v16 = vadd.f32 1e-05, %v451_v15 }
 0x3e5   :  { %587 = vrsqrt.f32 %v453_v16 }
 0x3ef   :  { %v588_v20 = vpop.eup %587 }
 0x3f0   :  { %v455_v21 = vmul.f32 %v588_v20, %v452_v18 }
 0x3f2   :  { %v460_v23 = vmul.f32 %v459_v19, %v455_v21 }
 0x3f4   :  { %v465_v24 = vadd.f32 %v464_v22, %v460_v23 }
 0x3f6   :  { %468 = vrot.lane.b32.xlu0 %v465_v24, %s642_s21  ;;  %466 = vst.msk [vmem:[#allocation2] sm:$0xff] %vm32_vm1, %v465_v24 }
 0x3f7   :  { %600 = shalt.err (!%p597_p4)
}
 0x3f8   :  { %s601_s23 = scalar_lea.hbm %s778_s2, 128 }
 0x3f9   :  { %p602_p5 = scmp.ne.s32.totalorder %s778_s2, %s601_s23  ;;  %p605_p6 = scmp.lt.u32.totalorder %s601_s23, %s778_s2 }
 0x3fb   :  { %p607_p7 = pnand %p605_p6, %p602_p5 }
 0x3fd   :  { %610 = shalt.err (!%p607_p7)
}
 0x3fe   :  { %481 = dma.vmem_to_hbm [thread:$0]  %s479_s20, 128, %s778_s2, [#allocation3]  }
 0x3ff   :  { %s643_s30 = smov [#allocation4]  }
 0x400   :  { %s488_s4 = sshll.u32 %s643_s30, 4  ;;  %s489_s4 = int_to_ptr.vmem [resolvable:$true] %s488_s4 }
 0x401   :  { %s611_s5 = scalar_lea.vmem %s489_s4, 128  ;;  %p616_p9 = scmp.lt.s32.totalorder %s489_s4, %s489_s4 }
 0x402   :  { %p612_p8 = scmp.ne.s32.totalorder %s489_s4, %s611_s5  ;;  %p617_p10 = scmp.lt.s32.totalorder %s611_s5, %s611_s5 }
 0x404   :  { %p618_p11 = por %p617_p10, %p616_p9 }
 0x406   :  { %p619_p12 = pnand %p618_p11, %p612_p8 }
 0x468   :  { %v469_v33 = vpop.permute.xlu0 %468 }
 0x469   :  { %471 = vst.msk [vmem:[#allocation4] sm:$0xff] %vm32_vm1, %v469_v33 }
 0x46a   :  { %622 = shalt.err (!%p619_p12)
}
 0x46b   :  { %s623_s8 = scalar_lea.hbm %s779_s3, 128 }
 0x46c   :  { %p624_p13 = scmp.ne.s32.totalorder %s779_s3, %s623_s8  ;;  %p627_p0 = scmp.lt.u32.totalorder %s623_s8, %s779_s3 }
 0x46e   :  { %p629_p1 = pnand %p627_p0, %p624_p13 }
 0x470   :  { %632 = shalt.err (!%p629_p1)
}
 0x471   :  { %491 = dma.vmem_to_hbm [thread:$0]  %s489_s4, 128, %s779_s3, [#allocation5]  }
 0x472   :  { %633 = dma.done.wait [#allocation3], 128  }
 0x473   :  { %634 = vsyncadd [#allocation3], 4294967168 }
 0x474   :  { %635 = dma.done.wait [#allocation5], 128  }
 0x475   :  { %636 = vsyncadd [#allocation5], 4294967168 }
 0x476   :  { %498 = vsyncpa [#allocation3], 1 }
 0x477   :  { %499 = vsyncpa [#allocation5], 1 }

</bundles_post_ra>
